<compile_context>
chip_gen: v5e
topology: v5e:2x2
jax: 0.10.0
libtpu: 0.0.40
codegen_flags: <defaults>
</compile_context>

<pallas_src>
import jax
import jax.numpy as jnp
from jax.experimental import pallas as pl
from jax.experimental.pallas import tpu as pltpu

LANE = 128   # TPU lane width: all matmul N dims / output are padded to this
H0 = 128     # fc0 out features (already lane-dense)
H1 = 64      # fc1 out features (zero-padded to LANE)
SUB = 16     # batch granularity: covers bf16 (16,128) and f32 (8,128) tiling


def actor_kernel(x_ref, w0_ref, b0_ref, w1_ref, b1_ref, w2_ref, b2_ref, o_ref):
    # In-kernel f32 -> bf16 cast of x (VPU op); avoids a separate XLA pad/cast
    # pass over x in HBM before the kernel.
    x = x_ref[...].astype(w0_ref.dtype)
    # fc0 + relu  (bf16 MXU operands, f32 accumulate + f32 epilogue)
    h0 = jnp.dot(x, w0_ref[...], preferred_element_type=jnp.float32)
    h0 = jnp.maximum(h0 + b0_ref[...], 0.0)
    # fc1 + relu  (out lanes zero-padded to 128; ReLU keeps the padding at 0)
    h1 = jnp.dot(h0.astype(w1_ref.dtype), w1_ref[...],
                 preferred_element_type=jnp.float32)
    h1 = jnp.maximum(h1 + b1_ref[...], 0.0)
    # fc2 + tanh  (lane-dense 128-wide output; real action columns sliced later)
    a = jnp.dot(h1.astype(w2_ref.dtype), w2_ref[...],
                preferred_element_type=jnp.float32)
    # f32 epilogue, bf16 store: halves the dominant HBM writeback stream.
    o_ref[...] = jnp.tanh(a + b2_ref[...]).astype(o_ref.dtype)


def _round_up(x, m):
    return (x + m - 1) // m * m


def _choose_tiling(batch, tile_m):
    """Pick (tm, Bp) with tm | Bp, both multiples of SUB, bounded dead-row
    work, and >= 2 grid steps whenever the batch is big enough (v7x megacore)."""
    batch = max(int(batch), 1)
    tile_m = max(SUB, (int(tile_m) // SUB) * SUB)
    tm = min(tile_m, _round_up(batch, SUB))
    # v7x: a single grid step means dimension_semantics=("parallel",) can't
    # shard across the two TensorCores -> force >= 2 steps when batch >= 32.
    if batch >= 2 * SUB:
        tm = min(tm, _round_up(pl.cdiv(batch, 2), SUB))
    # Keep padded ("dead") rows below ~1/8 of the padded batch by shrinking
    # the tile for awkward batch sizes (down to the SUB-row minimum).
    while tm > SUB and (_round_up(batch, tm) - batch) * 8 > _round_up(batch, tm):
        tm = max(SUB, _round_up(tm // 2, SUB))
    return tm, _round_up(batch, tm)


def prepare_actor_params(params, compute_dtype=jnp.bfloat16):
    """Pad + cast the weights once per parameter update (NOT per forward call).

    Weights are stored (in_features, out_features) so y = x @ W + b matches
    PyTorch Linear(x) = x @ W.T + b, with narrow dims zero-padded to 128 lanes.
    Correctness of the lane padding relies on: zero pad columns of w1p/b1p,
    zero pad rows of w2p/b2p, and ReLU(0) = 0 -> padded action lanes come out
    as tanh(0) = 0 and are sliced away. Re-check this if the activation or
    init changes.
    """
    w0, b0, w1, b1, w2, b2 = params
    obs_dim = w0.shape[0]
    action_dim = w2.shape[1]
    assert w0.shape == (obs_dim, H0) and b0.shape == (H0,)
    assert w1.shape == (H0, H1) and b1.shape == (H1,)
    assert w2.shape == (H1, action_dim) and b2.shape == (action_dim,)
    assert action_dim <= LANE, "action_dim > 128 needs an extra lane tile"

    w0p = w0.astype(compute_dtype)                                     # (obs, 128)
    b0p = b0.reshape(1, H0).astype(jnp.float32)
    w1p = jnp.zeros((H0, LANE), compute_dtype).at[:, :H1].set(
        w1.astype(compute_dtype))
    b1p = jnp.zeros((1, LANE), jnp.float32).at[:, :H1].set(
        b1.reshape(1, H1).astype(jnp.float32))
    w2p = jnp.zeros((LANE, LANE), compute_dtype).at[:H1, :action_dim].set(
        w2.astype(compute_dtype))
    b2p = jnp.zeros((1, LANE), jnp.float32).at[:, :action_dim].set(
        b2.reshape(1, action_dim).astype(jnp.float32))
    return (w0p, b0p, w1p, b1p, w2p, b2p)


def actor_forward(x, prepared_params, action_dim, *, tile_m=1024):
    """relu(fc0) -> relu(fc1) -> tanh(fc2) with PyTorch Linear semantics.

    `prepared_params` must come from prepare_actor_params() (weight padding /
    bf16 cast hoisted out of the per-call path).
    """
    w0p, b0p, w1p, b1p, w2p, b2p = prepared_params
    B, obs_dim = x.shape
    assert w0p.shape[0] == obs_dim

    tm, Bp = _choose_tiling(B, tile_m)
    # Only touch x if the batch actually needs padding (zero rows just produce
    # tanh(b) rows that are sliced away below).
    xp = x if Bp == B else jnp.zeros((Bp, obs_dim), x.dtype).at[:B].set(x)

    grid = (Bp // tm,)
    resident = lambda shape: pl.BlockSpec(shape, lambda i: (0, 0))  # stays in VMEM

    flops = 2 * Bp * (obs_dim * H0 + H0 * LANE + LANE * LANE)
    bytes_accessed = (
        Bp * obs_dim * x.dtype.itemsize                       # x read (f32)
        + sum(a.size * a.dtype.itemsize
              for a in (w0p, b0p, w1p, b1p, w2p, b2p))        # resident weights
        + Bp * LANE * 2                                       # bf16 writeback
    )

    out = pl.pallas_call(
        actor_kernel,
        out_shape=jax.ShapeDtypeStruct((Bp, LANE), jnp.bfloat16),
        grid=grid,
        in_specs=[
            pl.BlockSpec((tm, obs_dim), lambda i: (i, 0)),    # x: streamed over batch
            resident(w0p.shape), resident(b0p.shape),
            resident(w1p.shape), resident(b1p.shape),
            resident(w2p.shape), resident(b2p.shape),
        ],
        out_specs=pl.BlockSpec((tm, LANE), lambda i: (i, 0)),
        compiler_params=pltpu.CompilerParams(
            dimension_semantics=("parallel",)),               # v7x: shard batch over 2 TCs
        cost_estimate=pl.CostEstimate(
            flops=flops,
            transcendentals=Bp * LANE,
            bytes_accessed=bytes_accessed),
    )(xp, w0p, b0p, w1p, b1p, w2p, b2p)

    # Slice away batch + lane padding; return f32 actions (module semantics).
    return out[:B, :action_dim].astype(jnp.float32)


def init_linear(key, in_features, out_features):
    # PyTorch nn.Linear default init: U(-1/sqrt(in), 1/sqrt(in)) for W and b.
    kw, kb = jax.random.split(key)
    bound = 1.0 / jnp.sqrt(jnp.float32(in_features))
    # stored transposed: (in, out)
    w = jax.random.uniform(kw, (in_features, out_features), jnp.float32,
                           minval=-bound, maxval=bound)
    b = jax.random.uniform(kb, (out_features,), jnp.float32,
                           minval=-bound, maxval=bound)
    return w, b


if __name__ == "__main__":
    obs_dim = 32
    action_dim = 8
    batch = 2

    key = jax.random.PRNGKey(0)
    kx, k0, k1, k2 = jax.random.split(key, 4)

    x = jax.random.normal(kx, (batch, obs_dim), jnp.float32)
    w0, b0 = init_linear(k0, obs_dim, H0)
    w1, b1 = init_linear(k1, H0, H1)
    w2, b2 = init_linear(k2, H1, action_dim)
    params = (w0, b0, w1, b1, w2, b2)

    # Pad / bf16-cast the weights once (hoisted out of the per-call path).
    prepared = prepare_actor_params(params)

    fwd = jax.jit(actor_forward, static_argnums=(2,))
    out = jax.block_until_ready(fwd(x, prepared, action_dim))

    # f32 reference (PyTorch semantics); kernel uses bf16 MXU operands with
    # f32 accumulation and a bf16 HBM output, so compare at bf16 tolerance.
    ref = jnp.maximum(x @ w0 + b0, 0.0)
    ref = jnp.maximum(ref @ w1 + b1, 0.0)
    ref = jnp.tanh(ref @ w2 + b2)
    assert out.shape == (batch, action_dim)
    assert jnp.allclose(out, ref, atol=3e-2, rtol=3e-2), float(jnp.max(jnp.abs(out - ref)))

    print("KERNEL_OK")
</pallas_src>

<mosaic_0001>
module attributes {stable_mosaic.version = 11 : i64} {
  func.func @actor_kernel(%arg0: i32, %arg1: memref<16x32xf32, #tpu.memory_space<vmem>>, %arg2: memref<32x128xbf16, #tpu.memory_space<vmem>>, %arg3: memref<1x128xf32, #tpu.memory_space<vmem>>, %arg4: memref<128x128xbf16, #tpu.memory_space<vmem>>, %arg5: memref<1x128xf32, #tpu.memory_space<vmem>>, %arg6: memref<128x128xbf16, #tpu.memory_space<vmem>>, %arg7: memref<1x128xf32, #tpu.memory_space<vmem>>, %arg8: memref<16x128xbf16, #tpu.memory_space<vmem>>) attributes {dimension_semantics = [#tpu.dimension_semantics<parallel>], iteration_bounds = array<i64: 1>, scalar_prefetch = 0 : i64, scratch_operands = 0 : i64, tpu.core_type = #tpu.core_type<tc>, window_params = [{transform_indices = @transform_0, window_bounds = array<i64: 16, 32>}, {pipeline_mode = #tpu.pipeline_mode<synchronous>, transform_indices = @transform_1, window_bounds = array<i64: 32, 128>}, {pipeline_mode = #tpu.pipeline_mode<synchronous>, transform_indices = @transform_2, window_bounds = array<i64: 1, 128>}, {pipeline_mode = #tpu.pipeline_mode<synchronous>, transform_indices = @transform_3, window_bounds = array<i64: 128, 128>}, {pipeline_mode = #tpu.pipeline_mode<synchronous>, transform_indices = @transform_4, window_bounds = array<i64: 1, 128>}, {pipeline_mode = #tpu.pipeline_mode<synchronous>, transform_indices = @transform_5, window_bounds = array<i64: 128, 128>}, {pipeline_mode = #tpu.pipeline_mode<synchronous>, transform_indices = @transform_6, window_bounds = array<i64: 1, 128>}, {transform_indices = @transform_7, window_bounds = array<i64: 16, 128>}]} {
    %c0 = arith.constant 0 : index
    %c0_0 = arith.constant 0 : index
    %0 = vector.load %arg1[%c0, %c0_0] : memref<16x32xf32, #tpu.memory_space<vmem>>, vector<16x32xf32>
    %1 = arith.truncf %0 : vector<16x32xf32> to vector<16x32xbf16>
    %c0_1 = arith.constant 0 : index
    %c0_2 = arith.constant 0 : index
    %2 = vector.load %arg2[%c0_1, %c0_2] : memref<32x128xbf16, #tpu.memory_space<vmem>>, vector<32x128xbf16>
    %cst = arith.constant dense<0.000000e+00> : vector<16x128xf32>
    %3 = tpu.matmul %1, %2, %cst {dimension_numbers = #tpu.dot_dimension_numbers<[1], [0], [0], [1], [0, 0, 1, 1], [], []>} : vector<16x32xbf16>, vector<32x128xbf16>, vector<16x128xf32> -> vector<16x128xf32>
    %c0_3 = arith.constant 0 : index
    %c0_4 = arith.constant 0 : index
    %4 = vector.load %arg3[%c0_3, %c0_4] : memref<1x128xf32, #tpu.memory_space<vmem>>, vector<1x128xf32>
    %5 = vector.broadcast %4 : vector<1x128xf32> to vector<16x128xf32>
    %6 = arith.addf %3, %5 : vector<16x128xf32>
    %cst_5 = arith.constant 0.000000e+00 : f32
    %7 = vector.broadcast %cst_5 : f32 to vector<16x128xf32>
    %8 = arith.maximumf %6, %7 : vector<16x128xf32>
    %9 = arith.truncf %8 : vector<16x128xf32> to vector<16x128xbf16>
    %c0_6 = arith.constant 0 : index
    %c0_7 = arith.constant 0 : index
    %10 = vector.load %arg4[%c0_6, %c0_7] : memref<128x128xbf16, #tpu.memory_space<vmem>>, vector<128x128xbf16>
    %cst_8 = arith.constant dense<0.000000e+00> : vector<16x128xf32>
    %11 = tpu.matmul %9, %10, %cst_8 {dimension_numbers = #tpu.dot_dimension_numbers<[1], [0], [0], [1], [0, 0, 1, 1], [], []>} : vector<16x128xbf16>, vector<128x128xbf16>, vector<16x128xf32> -> vector<16x128xf32>
    %c0_9 = arith.constant 0 : index
    %c0_10 = arith.constant 0 : index
    %12 = vector.load %arg5[%c0_9, %c0_10] : memref<1x128xf32, #tpu.memory_space<vmem>>, vector<1x128xf32>
    %13 = vector.broadcast %12 : vector<1x128xf32> to vector<16x128xf32>
    %14 = arith.addf %11, %13 : vector<16x128xf32>
    %cst_11 = arith.constant 0.000000e+00 : f32
    %15 = vector.broadcast %cst_11 : f32 to vector<16x128xf32>
    %16 = arith.maximumf %14, %15 : vector<16x128xf32>
    %17 = arith.truncf %16 : vector<16x128xf32> to vector<16x128xbf16>
    %c0_12 = arith.constant 0 : index
    %c0_13 = arith.constant 0 : index
    %18 = vector.load %arg6[%c0_12, %c0_13] : memref<128x128xbf16, #tpu.memory_space<vmem>>, vector<128x128xbf16>
    %cst_14 = arith.constant dense<0.000000e+00> : vector<16x128xf32>
    %19 = tpu.matmul %17, %18, %cst_14 {dimension_numbers = #tpu.dot_dimension_numbers<[1], [0], [0], [1], [0, 0, 1, 1], [], []>} : vector<16x128xbf16>, vector<128x128xbf16>, vector<16x128xf32> -> vector<16x128xf32>
    %c0_15 = arith.constant 0 : index
    %c0_16 = arith.constant 0 : index
    %20 = vector.load %arg7[%c0_15, %c0_16] : memref<1x128xf32, #tpu.memory_space<vmem>>, vector<1x128xf32>
    %21 = vector.broadcast %20 : vector<1x128xf32> to vector<16x128xf32>
    %22 = arith.addf %19, %21 : vector<16x128xf32>
    %23 = math.tanh %22 : vector<16x128xf32>
    %24 = arith.truncf %23 : vector<16x128xf32> to vector<16x128xbf16>
    %c0_17 = arith.constant 0 : index
    %c0_18 = arith.constant 0 : index
    %25 = vector.load %arg8[%c0_17, %c0_18] : memref<16x128xbf16, #tpu.memory_space<vmem>>, vector<16x128xbf16>
    tpu.vector_store %arg8[%c0_17, %c0_18], %24 {strides = array<i32>} : memref<16x128xbf16, #tpu.memory_space<vmem>>, vector<16x128xbf16>,
    return
  }
  func.func @transform_0(%arg0: i32) -> (i32, i32) {
    %c0_i32 = arith.constant 0 : i32
    %c0_i32_0 = arith.constant 0 : i32
    return %arg0, %c0_i32 : i32, i32
  }
  func.func @transform_1(%arg0: i32) -> (i32, i32) {
    %c0_i32 = arith.constant 0 : i32
    %c0_i32_0 = arith.constant 0 : i32
    %c0_i32_1 = arith.constant 0 : i32
    return %c0_i32, %c0_i32_0 : i32, i32
  }
  func.func @transform_2(%arg0: i32) -> (i32, i32) {
    %c0_i32 = arith.constant 0 : i32
    %c0_i32_0 = arith.constant 0 : i32
    %c0_i32_1 = arith.constant 0 : i32
    return %c0_i32, %c0_i32_0 : i32, i32
  }
  func.func @transform_3(%arg0: i32) -> (i32, i32) {
    %c0_i32 = arith.constant 0 : i32
    %c0_i32_0 = arith.constant 0 : i32
    %c0_i32_1 = arith.constant 0 : i32
    return %c0_i32, %c0_i32_0 : i32, i32
  }
  func.func @transform_4(%arg0: i32) -> (i32, i32) {
    %c0_i32 = arith.constant 0 : i32
    %c0_i32_0 = arith.constant 0 : i32
    %c0_i32_1 = arith.constant 0 : i32
    return %c0_i32, %c0_i32_0 : i32, i32
  }
  func.func @transform_5(%arg0: i32) -> (i32, i32) {
    %c0_i32 = arith.constant 0 : i32
    %c0_i32_0 = arith.constant 0 : i32
    %c0_i32_1 = arith.constant 0 : i32
    return %c0_i32, %c0_i32_0 : i32, i32
  }
  func.func @transform_6(%arg0: i32) -> (i32, i32) {
    %c0_i32 = arith.constant 0 : i32
    %c0_i32_0 = arith.constant 0 : i32
    %c0_i32_1 = arith.constant 0 : i32
    return %c0_i32, %c0_i32_0 : i32, i32
  }
  func.func @transform_7(%arg0: i32) -> (i32, i32) {
    %c0_i32 = arith.constant 0 : i32
    %c0_i32_0 = arith.constant 0 : i32
    return %arg0, %c0_i32 : i32, i32
  }
}

</mosaic_0001>

<bundles_post_ra>
// kernel: actor_forward.1
= control target key start
LH: loop header
LB: loop body
LE: loop exit
PB: predicated region body
PF: predicated region fallthrough
CT: control target
= control target key end

     0   :  { %12 = vsyncpa [#allocation3], 0  ;;  %s515_s0 = inlined_call_operand.vmem [shape: f32[16,32], index: 0, kind: input, shape index: {}]   ;;  %s516_s1 = inlined_call_operand.vmem [shape: bf16[32,128], index: 1, kind: input, shape index: {}]   ;;  %s517_s2 = inlined_call_operand.vmem [shape: f32[1,128], index: 2, kind: input, shape index: {}]   ;;  %s518_s3 = inlined_call_operand.hbm [shape: bf16[128,128], index: 3, kind: input, shape index: {}]   ;;  %s519_s4 = inlined_call_operand.vmem [shape: f32[1,128], index: 4, kind: input, shape index: {}]   ;;  %s520_s5 = inlined_call_operand.hbm [shape: bf16[128,128], index: 5, kind: input, shape index: {}]   ;;  %s521_s6 = inlined_call_operand.vmem [shape: f32[1,128], index: 6, kind: input, shape index: {}]   ;;  %s522_s7 = inlined_call_operand.vmem [shape: bf16[16,128], index: 7, kind: output, shape index: {}]  }
   0x1   :  { %s24_s26 = sshll.u32 %s518_s3, 4  ;;  %s25_s26 = int_to_ptr.hbm [resolvable:$true] %s24_s26 }
   0x2   :  { %13 = vsyncpa [#allocation5], 0  ;;  %s441_s27 = smov [#allocation2]   ;;  %s39_s8 = sshll.u32 %s520_s5, 4  ;;  %s40_s8 = int_to_ptr.hbm [resolvable:$true] %s39_s8 }
   0x3   :  { %s26_s28 = sshll.u32 %s441_s27, 4  ;;  %s442_s9 = smov 64   ;;  %s27_s28 = int_to_ptr.vmem [resolvable:$true] %s26_s28 }
   0x4   :  { %s443_s10 = smov 4   ;;  %s444_s11 = smov [#allocation4]  }
   0x5   :  { %32 = dma.hbm_to_vmem [thread:$0]  %s25_s26, 1024, %s27_s28, [#allocation3], %s442_s9, %s442_s9, %s443_s10  }
   0x6   :  { %s41_s12 = sshll.u32 %s444_s11, 4  ;;  %s42_s12 = int_to_ptr.vmem [resolvable:$true] %s41_s12 }
   0x7   :  { %47 = dma.hbm_to_vmem [thread:$0]  %s40_s8, 1024, %s42_s12, [#allocation5], %s442_s9, %s442_s9, %s443_s10  }
   0x8   :  { %437 = dma.done.wait [#allocation3], 1024  }
   0x9   :  { %438 = vsyncadd [#allocation3], 4294966272 }
   0xa   :  { %439 = dma.done.wait [#allocation5], 1024  }
   0xb   :  { %440 = vsyncadd [#allocation5], 4294966272  ;;  %v356_v0 = vld [vmem:[%s516_s1 + $0x8] sm:$0xff]  ;;  %v355_v1 = vld [vmem:[%s516_s1] sm:$0xff]  ;;  %vm82_vm0 = vcmask 261120  }
   0xc   :  { %v364_v2 = vld [vmem:[#allocation2 + $0x38] sm:$0xff]  ;;  %92 = vmatpush.bf16.msra.mxu0 %v356_v0  ;;  %v59_v3 = vld [vmem:[%s515_s0] sm:$0xff]  ;;  %v60_v4 = vld [vmem:[%s515_s0 + $0x8] sm:$0xff] }
   0xd   :  { %171 = vmatpush.bf16.msra.mxu1 %v364_v2  ;;  %v363_v5 = vld [vmem:[#allocation2 + $0x30] sm:$0xff]  ;;  %v61_v6 = vpack.c.bf16 %v60_v4, %v59_v3  ;;  %v362_v7 = vld [vmem:[#allocation2 + $0x28] sm:$0xff]  ;;  %v361_v8 = vld [vmem:[#allocation2 + $0x20] sm:$0xff] }
   0xe   :  { %v360_v9 = vld [vmem:[#allocation2 + $0x18] sm:$0xff]  ;;  %v359_v10 = vld [vmem:[#allocation2 + $0x10] sm:$0xff]  ;;  %v358_v11 = vld [vmem:[#allocation2 + $0x8] sm:$0xff] }
   0xf   :  { %v357_v12 = vld [vmem:[#allocation2] sm:$0xff]  ;;  %v372_v13 = vld [vmem:[#allocation4 + $0x38] sm:$0xff]  ;;  %v371_v14 = vld [vmem:[#allocation4 + $0x30] sm:$0xff] }
  0x10   :  { %93 = vmatpush.bf16.msra.mxu0 %v355_v1  ;;  %256 = vmatpush.bf16.msra.mxu2 %v372_v13  ;;  %v370_v15 = vld [vmem:[#allocation4 + $0x28] sm:$0xff]  ;;  %v369_v16 = vld [vmem:[#allocation4 + $0x20] sm:$0xff]  ;;  %v368_v25 = vld [vmem:[#allocation4 + $0x18] sm:$0xff] }
  0x11   :  { %172 = vmatpush.bf16.msra.mxu1 %v363_v5  ;;  %v382_v18 = vld [vmem:[%s517_s2] ss:$0 sm:$0xff]  ;;  %v367_v26 = vld [vmem:[#allocation4 + $0x10] sm:$0xff]  ;;  %v366_v27 = vld [vmem:[#allocation4 + $0x8] sm:$0xff] }
  0x12   :  { %v365_v28 = vld [vmem:[#allocation4] sm:$0xff] }
  0x13   :  { %290 = vmatmul.msk.bf16.vlgmr.msra.gmra.mxu0 %vm82_vm0, %v61_v6  ;;  %v383_v30 = vld [vmem:[%s519_s4] ss:$0 sm:$0xff] }
  0x14   :  { %257 = vmatpush.bf16.msra.mxu2 %v371_v14  ;;  %v384_v38 = vld [vmem:[%s521_s6] ss:$0 sm:$0xff] }
  0x15   :  { %173 = vmatpush.bf16.msra.mxu1 %v362_v7 }
  0x18   :  { %258 = vmatpush.bf16.msra.mxu2 %v370_v15 }
  0x19   :  { %174 = vmatpush.bf16.msra.mxu1 %v361_v8 }
  0x1c   :  { %259 = vmatpush.bf16.msra.mxu2 %v369_v16 }
  0x1d   :  { %175 = vmatpush.bf16.msra.mxu1 %v360_v9 }
  0x20   :  { %260 = vmatpush.bf16.msra.mxu2 %v368_v25 }
  0x21   :  { %176 = vmatpush.bf16.msra.mxu1 %v359_v10 }
  0x24   :  { %261 = vmatpush.bf16.msra.mxu2 %v367_v26 }
  0x25   :  { %177 = vmatpush.bf16.msra.mxu1 %v358_v11 }
  0x28   :  { %262 = vmatpush.bf16.msra.mxu2 %v366_v27 }
  0x29   :  { %178 = vmatpush.bf16.msra.mxu1 %v357_v12 }
  0x2c   :  { %263 = vmatpush.bf16.msra.mxu2 %v365_v28 }
  0x90   :  { %v95_v17 = vpop.f32.mrf.mxu0 }
  0x91   :  { %v96_v19 = vadd.f32 %v382_v18, %v95_v17 }
  0x93   :  { %v100_v22 = vmax.f32 %v96_v19, 0.0 }
  0x98   :  { %v97_v20 = vpop.f32.mrf.mxu0 }
  0x99   :  { %v98_v21 = vadd.f32 %v382_v18, %v97_v20 }
  0x9b   :  { %v101_v23 = vmax.f32 %v98_v21, 0.0 }
  0x9d   :  { %v102_v24 = vpack.c.bf16 %v101_v23, %v100_v22 }
  0x9f   :  { %179 = vmatmul.bf16.vlgmr.msra.gmra.mxu1 %v102_v24 }
 0x11c   :  { %v180_v29 = vpop.f32.mrf.mxu1 }
 0x11d   :  { %v181_v31 = vadd.f32 %v383_v30, %v180_v29 }
 0x11f   :  { %v185_v34 = vmax.f32 %v181_v31, 0.0 }
 0x124   :  { %v182_v32 = vpop.f32.mrf.mxu1 }
 0x125   :  { %v183_v33 = vadd.f32 %v383_v30, %v182_v32 }
 0x127   :  { %v186_v35 = vmax.f32 %v183_v33, 0.0 }
 0x129   :  { %v187_v36 = vpack.c.bf16 %v186_v35, %v185_v34 }
 0x12b   :  { %264 = vmatmul.bf16.vlgmr.msra.gmra.mxu2 %v187_v36 }
 0x1ae   :  { %v265_v37 = vpop.f32.mrf.mxu2 }
 0x1af   :  { %v266_v39 = vadd.f32 %v384_v38, %v265_v37 }
 0x1b1   :  { %385 = vtanh.f32 %v266_v39 }
 0x1b6   :  { %v267_v40 = vpop.f32.mrf.mxu2 }
 0x1b7   :  { %v268_v41 = vadd.f32 %v384_v38, %v267_v40  ;;  %v386_v42 = vpop.eup %385 }
 0x1b9   :  { %387 = vtanh.f32 %v268_v41 }
 0x1bf   :  { %v388_v43 = vpop.eup %387 }
 0x1c0   :  { %v376_v44 = vpack.c.bf16 %v388_v43, %v386_v42 }
 0x1c2   :  { %377 = vst [vmem:[%s522_s7] sm:$0xff] %v376_v44  }
 0x1c3   :  { %280 = vsyncpa [#allocation3], 1 }
 0x1c4   :  { %281 = vsyncpa [#allocation5], 1 }

</bundles_post_ra>
